<compile_context>
chip_gen: v5e
topology: v5e:2x2
jax: 0.10.0
libtpu: 0.0.40
codegen_flags: <defaults>
</compile_context>

<pallas_src>
from functools import partial

import jax
import jax.numpy as jnp
from jax.experimental import pallas as pl
from jax.experimental.pallas import tpu as pltpu


def conv_block_kernel(x_ref, w_ref, b_ref, o_ref):
    # x_ref: (1, Hp, Wp*Cin)        one padded image, channels packed in lanes
    # w_ref: (KS, Wp*Cin, Wo*Cout)  banded (Toeplitz-along-W) weight, bf16
    # b_ref: (1, Wo*Cout)           bias tiled across the lane-dense out row
    # o_ref: (1, Ho, Wo*Cout)
    KS = w_ref.shape[0]
    Ho = o_ref.shape[1]

    acc = None
    for kh in range(KS):                      # KS fused matmuls, K=Wp*Cin, N=Wo*Cout
        slab = x_ref[0, kh:kh + Ho, :].astype(jnp.bfloat16)      # (Ho, Wp*Cin)
        part = jnp.dot(slab, w_ref[kh], preferred_element_type=jnp.float32)
        acc = part if acc is None else acc + part                # (Ho, Wo*Cout) f32

    acc = jnp.maximum(acc + b_ref[...], 0.0)                     # bias + ReLU
    o_ref[0] = acc.astype(o_ref.dtype)                           # full-lane stores


def _banded_weight(w_hwio, Wp, Wo, st, out_dtype):
    """(KS, KS, Cin, Cout) -> (KS, Wp*Cin, Wo*Cout) banded conv-as-matmul weight.

    band[kh, p*Cin + ci, wo*Cout + o] = W[kh, kw, ci, o]  iff  p == wo*st + kw.
    """
    KS, _, Cin, Cout = w_hwio.shape
    wk = jnp.zeros((KS, Wp, Cin, Wo, Cout), jnp.float32)
    for kw in range(KS):
        sel = jnp.zeros((Wp, Wo), jnp.float32)
        sel = sel.at[jnp.arange(Wo) * st + kw, jnp.arange(Wo)].set(1.0)
        wk = wk + jnp.einsum("pw,kio->kpiwo", sel, w_hwio[:, kw].astype(jnp.float32))
    return wk.reshape(KS, Wp * Cin, Wo * Cout).astype(out_dtype)


@partial(jax.jit, static_argnums=(3, 4))
def conv2d_block_forward(x_nchw, weight_oihw, bias, stride, padding):
    """Pallas Conv2dBlock forward. x_nchw: (B, Cin, H, W) -> (B, Cout, Ho, Wo)."""
    assert stride == 1  # TODO(synk): general stride unimplemented (config uses st=1)
    B, Cin, H, W = x_nchw.shape
    Cout, _, KS, _ = weight_oihw.shape
    Hp, Wp = H + 2 * padding, W + 2 * padding
    Ho, Wo = Hp - KS + 1, Wp - KS + 1

    # glue: NCHW -> NHWC -> (B, Hp, Wp*Cin); channels packed into the lane axis.
    x_nhwc = jnp.transpose(x_nchw, (0, 2, 3, 1))
    x_pad = jnp.pad(x_nhwc, ((0, 0), (padding, padding), (padding, padding), (0, 0)))
    x2 = x_pad.reshape(B, Hp, Wp * Cin)

    # weight / bias precompute (one-time layout work, not per-activation).
    w_hwio = jnp.transpose(weight_oihw, (2, 3, 1, 0))                 # (KS,KS,Cin,Cout)
    w_band = _banded_weight(w_hwio, Wp, Wo, stride, jnp.bfloat16)     # (KS,Wp*Cin,Wo*Cout)
    b_row = jnp.tile(bias.astype(jnp.float32), Wo).reshape(1, Wo * Cout)

    cost = pl.CostEstimate(
        flops=2 * B * KS * Ho * (Wp * Cin) * (Wo * Cout),
        transcendentals=0,
        bytes_accessed=(x2.size * x2.dtype.itemsize
                        + w_band.size * w_band.dtype.itemsize
                        + b_row.size * 4
                        + B * Ho * Wo * Cout * x_nchw.dtype.itemsize),
    )

    out2 = pl.pallas_call(
        conv_block_kernel,
        out_shape=jax.ShapeDtypeStruct((B, Ho, Wo * Cout), x_nchw.dtype),
        grid_spec=pltpu.PrefetchScalarGridSpec(
            num_scalar_prefetch=0,
            grid=(B,),
            in_specs=[
                pl.BlockSpec((1, Hp, Wp * Cin), lambda b: (b, 0, 0)),
                pl.BlockSpec((KS, Wp * Cin, Wo * Cout), lambda b: (0, 0, 0)),
                pl.BlockSpec((1, Wo * Cout), lambda b: (0, 0)),
            ],
            out_specs=pl.BlockSpec((1, Ho, Wo * Cout), lambda b: (b, 0, 0)),
        ),
        compiler_params=pltpu.CompilerParams(
            dimension_semantics=("parallel",)),
        cost_estimate=cost,
    )(x2, w_band, b_row)

    # lane-dense (B, Ho, Wo*Cout) -> NCHW to match PyTorch output convention.
    out_nhwc = out2.reshape(B, Ho, Wo, Cout)
    return jnp.transpose(out_nhwc, (0, 3, 1, 2))


if __name__ == "__main__":
    # Module config: Conv2dBlock(in_dim=4, out_dim=8, ks=3, st=1, padding=1)
    B, Cin, H, W = 2, 4, 16, 16
    Cout, KS, ST, PAD = 8, 3, 1, 1

    key = jax.random.PRNGKey(0)
    kx, kw, kb = jax.random.split(key, 3)
    x = jax.random.normal(kx, (B, Cin, H, W), dtype=jnp.float32)
    # deterministic synthetic params (PyTorch Conv2d weight shape: (O, I, KS, KS))
    weight = jax.random.normal(kw, (Cout, Cin, KS, KS), dtype=jnp.float32) * 0.1
    bias = jax.random.normal(kb, (Cout,), dtype=jnp.float32) * 0.1

    out = conv2d_block_forward(x, weight, bias, ST, PAD)
    out = jax.block_until_ready(out)

    # reference check against XLA conv (same semantics as F.conv2d + relu)
    ref = jax.lax.conv_general_dilated(
        jnp.pad(x, ((0, 0), (0, 0), (PAD, PAD), (PAD, PAD))),
        weight, window_strides=(ST, ST), padding="VALID",
        dimension_numbers=("NCHW", "OIHW", "NCHW"))
    ref = jnp.maximum(ref + bias[None, :, None, None], 0.0)

    assert out.shape == (B, Cout, H, W)
    # bf16 MXU inputs with f32 accumulation -> loosened tolerance vs f32 ref.
    assert jnp.allclose(out, ref, atol=5e-2, rtol=5e-2), float(
        jnp.max(jnp.abs(out - ref)))

    print("KERNEL_OK")
</pallas_src>

<mosaic_0001>
module attributes {stable_mosaic.version = 11 : i64} {
  func.func @conv_block_kernel(%arg0: i32, %arg1: memref<1x18x72xf32, #tpu.memory_space<vmem>>, %arg2: memref<3x72x128xbf16, #tpu.memory_space<vmem>>, %arg3: memref<1x128xf32, #tpu.memory_space<vmem>>, %arg4: memref<1x16x128xf32, #tpu.memory_space<vmem>>) attributes {dimension_semantics = [#tpu.dimension_semantics<parallel>], iteration_bounds = array<i64: 2>, scalar_prefetch = 0 : i64, scratch_operands = 0 : i64, tpu.core_type = #tpu.core_type<tc>, window_params = [{transform_indices = @transform_0, window_bounds = array<i64: 1, 18, 72>}, {pipeline_mode = #tpu.pipeline_mode<synchronous>, transform_indices = @transform_1, window_bounds = array<i64: 3, 72, 128>}, {pipeline_mode = #tpu.pipeline_mode<synchronous>, transform_indices = @transform_2, window_bounds = array<i64: 1, 128>}, {transform_indices = @transform_3, window_bounds = array<i64: 1, 16, 128>}]} {
    %c0 = arith.constant 0 : index
    %c0_0 = arith.constant 0 : index
    %c0_1 = arith.constant 0 : index
    %0 = vector.load %arg1[%c0, %c0_0, %c0_1] : memref<1x18x72xf32, #tpu.memory_space<vmem>>, vector<1x16x72xf32>
    %1 = vector.shape_cast %0 : vector<1x16x72xf32> to vector<16x72xf32>
    %2 = arith.truncf %1 : vector<16x72xf32> to vector<16x72xbf16>
    %c0_2 = arith.constant 0 : index
    %c0_3 = arith.constant 0 : index
    %c0_4 = arith.constant 0 : index
    %3 = vector.load %arg2[%c0_2, %c0_3, %c0_4] : memref<3x72x128xbf16, #tpu.memory_space<vmem>>, vector<1x72x128xbf16>
    %4 = vector.shape_cast %3 : vector<1x72x128xbf16> to vector<72x128xbf16>
    %cst = arith.constant dense<0.000000e+00> : vector<16x128xf32>
    %5 = tpu.matmul %2, %4, %cst {dimension_numbers = #tpu.dot_dimension_numbers<[1], [0], [0], [1], [0, 0, 1, 1], [], []>} : vector<16x72xbf16>, vector<72x128xbf16>, vector<16x128xf32> -> vector<16x128xf32>
    %c0_5 = arith.constant 0 : index
    %c1 = arith.constant 1 : index
    %c0_6 = arith.constant 0 : index
    %6 = vector.load %arg1[%c0_5, %c1, %c0_6] : memref<1x18x72xf32, #tpu.memory_space<vmem>>, vector<1x16x72xf32>
    %7 = vector.shape_cast %6 : vector<1x16x72xf32> to vector<16x72xf32>
    %8 = arith.truncf %7 : vector<16x72xf32> to vector<16x72xbf16>
    %c1_7 = arith.constant 1 : index
    %c0_8 = arith.constant 0 : index
    %c0_9 = arith.constant 0 : index
    %9 = vector.load %arg2[%c1_7, %c0_8, %c0_9] : memref<3x72x128xbf16, #tpu.memory_space<vmem>>, vector<1x72x128xbf16>
    %10 = vector.shape_cast %9 : vector<1x72x128xbf16> to vector<72x128xbf16>
    %cst_10 = arith.constant dense<0.000000e+00> : vector<16x128xf32>
    %11 = tpu.matmul %8, %10, %cst_10 {dimension_numbers = #tpu.dot_dimension_numbers<[1], [0], [0], [1], [0, 0, 1, 1], [], []>} : vector<16x72xbf16>, vector<72x128xbf16>, vector<16x128xf32> -> vector<16x128xf32>
    %12 = arith.addf %5, %11 : vector<16x128xf32>
    %c0_11 = arith.constant 0 : index
    %c2 = arith.constant 2 : index
    %c0_12 = arith.constant 0 : index
    %13 = vector.load %arg1[%c0_11, %c2, %c0_12] : memref<1x18x72xf32, #tpu.memory_space<vmem>>, vector<1x16x72xf32>
    %14 = vector.shape_cast %13 : vector<1x16x72xf32> to vector<16x72xf32>
    %15 = arith.truncf %14 : vector<16x72xf32> to vector<16x72xbf16>
    %c2_13 = arith.constant 2 : index
    %c0_14 = arith.constant 0 : index
    %c0_15 = arith.constant 0 : index
    %16 = vector.load %arg2[%c2_13, %c0_14, %c0_15] : memref<3x72x128xbf16, #tpu.memory_space<vmem>>, vector<1x72x128xbf16>
    %17 = vector.shape_cast %16 : vector<1x72x128xbf16> to vector<72x128xbf16>
    %cst_16 = arith.constant dense<0.000000e+00> : vector<16x128xf32>
    %18 = tpu.matmul %15, %17, %cst_16 {dimension_numbers = #tpu.dot_dimension_numbers<[1], [0], [0], [1], [0, 0, 1, 1], [], []>} : vector<16x72xbf16>, vector<72x128xbf16>, vector<16x128xf32> -> vector<16x128xf32>
    %19 = arith.addf %12, %18 : vector<16x128xf32>
    %c0_17 = arith.constant 0 : index
    %c0_18 = arith.constant 0 : index
    %20 = vector.load %arg3[%c0_17, %c0_18] : memref<1x128xf32, #tpu.memory_space<vmem>>, vector<1x128xf32>
    %21 = vector.broadcast %20 : vector<1x128xf32> to vector<16x128xf32>
    %22 = arith.addf %19, %21 : vector<16x128xf32>
    %cst_19 = arith.constant 0.000000e+00 : f32
    %23 = vector.broadcast %cst_19 : f32 to vector<16x128xf32>
    %24 = arith.maximumf %22, %23 : vector<16x128xf32>
    %c0_20 = arith.constant 0 : index
    %c0_21 = arith.constant 0 : index
    %c0_22 = arith.constant 0 : index
    %25 = vector.load %arg4[%c0_20, %c0_21, %c0_22] : memref<1x16x128xf32, #tpu.memory_space<vmem>>, vector<1x16x128xf32>
    %26 = vector.shape_cast %25 : vector<1x16x128xf32> to vector<16x128xf32>
    %27 = vector.shape_cast %24 : vector<16x128xf32> to vector<1x16x128xf32>
    tpu.vector_store %arg4[%c0_20, %c0_21, %c0_22], %27 {strides = array<i32>} : memref<1x16x128xf32, #tpu.memory_space<vmem>>, vector<1x16x128xf32>,
    return
  }
  func.func @transform_0(%arg0: i32) -> (i32, i32, i32) {
    %c0_i32 = arith.constant 0 : i32
    %c0_i32_0 = arith.constant 0 : i32
    %c0_i32_1 = arith.constant 0 : i32
    return %arg0, %c0_i32, %c0_i32_0 : i32, i32, i32
  }
  func.func @transform_1(%arg0: i32) -> (i32, i32, i32) {
    %c0_i32 = arith.constant 0 : i32
    %c0_i32_0 = arith.constant 0 : i32
    %c0_i32_1 = arith.constant 0 : i32
    %c0_i32_2 = arith.constant 0 : i32
    return %c0_i32, %c0_i32_0, %c0_i32_1 : i32, i32, i32
  }
  func.func @transform_2(%arg0: i32) -> (i32, i32) {
    %c0_i32 = arith.constant 0 : i32
    %c0_i32_0 = arith.constant 0 : i32
    %c0_i32_1 = arith.constant 0 : i32
    return %c0_i32, %c0_i32_0 : i32, i32
  }
  func.func @transform_3(%arg0: i32) -> (i32, i32, i32) {
    %c0_i32 = arith.constant 0 : i32
    %c0_i32_0 = arith.constant 0 : i32
    %c0_i32_1 = arith.constant 0 : i32
    return %arg0, %c0_i32, %c0_i32_0 : i32, i32, i32
  }
}

</mosaic_0001>

<bundles_post_ra>
// kernel: tile.8
= control target key start
LH: loop header
LB: loop body
LE: loop exit
PB: predicated region body
PF: predicated region fallthrough
CT: control target
= control target key end

     0   :  { %s28_s0 = inlined_call_operand.vmem [shape: f32[8], index: 0, kind: input, shape index: {}]   ;;  %s29_s1 = inlined_call_operand.vmem [shape: f32[16,8], index: 1, kind: output, shape index: {}]  }
   0x1   :  { %v4_v0 = vld [vmem:[%s28_s0] ss:$0 sm:$0xff] }
   0x2   :  { %5 = vst [vmem:[%s29_s1] sm:$0xff] %v4_v0 }
   0x3   :  { %8 = vst [vmem:[%s29_s1 + $0x8] sm:$0xff] %v4_v0 }

// kernel: tile.9
= control target key start
LH: loop header
LB: loop body
LE: loop exit
PB: predicated region body
PF: predicated region fallthrough
CT: control target
= control target key end

     0   :  { %s131_s10 = smov 120   ;;  %s132_s11 = smov 104   ;;  %vm3_vm0 = vcmask 64512   ;;  %vm9_vm1 = vcmask 1048512   ;;  %vm15_vm2 = vcmask 982912   ;;  %vm21_vm3 = vcmask 917312   ;;  %s207_s0 = inlined_call_operand.vmem [shape: f32[16,8], index: 0, kind: input, shape index: {}]   ;;  %s208_s1 = inlined_call_operand.vmem [shape: f32[1,128], index: 1, kind: output, shape index: {}]  }
   0x1   :  { %v101_v0 = vld [vmem:[%s207_s0 + $0xf] sm:$0x1]   ;;  %v103_v1 = vld [vmem:[%s207_s0 + $0xd] sm:$0x1]   ;;  %v105_v2 = vld [vmem:[%s207_s0 + $0xb] sm:$0x1]  }
   0x2   :  { %7 = vrot.lane.b32.xlu0 %v101_v0, %s131_s10  ;;  %19 = vrot.lane.b32.xlu1 %v103_v1, %s132_s11  ;;  %s133_s14 = smov 88   ;;  %v102_v3 = vld [vmem:[%s207_s0 + $0xe] sm:$0x1]   ;;  %v104_v4 = vld [vmem:[%s207_s0 + $0xc] sm:$0x1]   ;;  %s134_s19 = smov 112  }
   0x3   :  { %31 = vrot.lane.b32.xlu2 %v105_v2, %s133_s14  ;;  %s135_s20 = smov 96   ;;  %v106_v5 = vld [vmem:[%s207_s0 + $0xa] sm:$0x1]   ;;  %s136_s23 = smov 80   ;;  %v107_v6 = vld [vmem:[%s207_s0 + $0x9] sm:$0x1]  }
   0x4   :  { %v108_v7 = vld [vmem:[%s207_s0 + $0x8] sm:$0x1]   ;;  %s137_s28 = smov 72   ;;  %s138_s29 = smov 64   ;;  %v109_v8 = vld [vmem:[%s207_s0 + $0x7] sm:$0x1]  }
   0x5   :  { %s139_s3 = smov 56   ;;  %v110_v9 = vld [vmem:[%s207_s0 + $0x6] sm:$0x1]   ;;  %v111_v10 = vld [vmem:[%s207_s0 + $0x5] sm:$0x1]   ;;  %s140_s8 = smov 48  }
   0x6   :  { %s141_s9 = smov 40   ;;  %v112_v11 = vld [vmem:[%s207_s0 + $0x4] sm:$0x1]   ;;  %s142_s12 = smov 32   ;;  %v113_v12 = vld [vmem:[%s207_s0 + $0x3] sm:$0x1]  }
   0x7   :  { %v114_v13 = vld [vmem:[%s207_s0 + $0x2] sm:$0x1]   ;;  %s143_s17 = smov 24   ;;  %s144_s18 = smov 16   ;;  %v115_v14 = vld [vmem:[%s207_s0 + $0x1] sm:$0x1]  }
   0x8   :  { %s145_s21 = smov 8   ;;  %v2_v15 = vld [vmem:[%s207_s0] sm:$0x1]   ;;  %vm27_vm4 = vcmask 851712   ;;  %vm33_vm5 = vcmask 786112   ;;  %vm39_vm6 = vcmask 720512  }
   0x9   :  { %4 = vst.msk [vmem:[#allocation0] sm:$0x1] %vm3_vm0, %v2_v15   ;;  %vm45_vm7 = vcmask 654912   ;;  %vm51_vm8 = vcmask 589312   ;;  %vm57_vm9 = vcmask 523712   ;;  %vm63_vm10 = vcmask 458112  }
   0xa   :  { %13 = vrot.lane.b32.xlu0 %v102_v3, %s134_s19  ;;  %25 = vrot.lane.b32.xlu1 %v104_v4, %s135_s20  ;;  %vm69_vm11 = vcmask 392512   ;;  %vm75_vm12 = vcmask 326912   ;;  %vm81_vm13 = vcmask 261312   ;;  %vm87_vm14 = vcmask 195712  }
   0xb   :  { %37 = vrot.lane.b32.xlu2 %v106_v5, %s136_s23  ;;  %vm93_vm15 = vcmask 130112  }
  0x12   :  { %43 = vrot.lane.b32.xlu0 %v107_v6, %s137_s28  ;;  %49 = vrot.lane.b32.xlu1 %v108_v7, %s138_s29 }
  0x13   :  { %55 = vrot.lane.b32.xlu2 %v109_v8, %s139_s3 }
  0x1a   :  { %61 = vrot.lane.b32.xlu0 %v110_v9, %s140_s8  ;;  %67 = vrot.lane.b32.xlu1 %v111_v10, %s141_s9 }
  0x1b   :  { %73 = vrot.lane.b32.xlu2 %v112_v11, %s142_s12 }
  0x22   :  { %79 = vrot.lane.b32.xlu0 %v113_v12, %s143_s17  ;;  %85 = vrot.lane.b32.xlu1 %v114_v13, %s144_s18 }
  0x23   :  { %91 = vrot.lane.b32.xlu2 %v115_v14, %s145_s21 }
  0x5d   :  { %v32_v16 = vpop.permute.xlu2 %31  }
  0x65   :  { %v38_v17 = vpop.permute.xlu2 %37  }
  0x6d   :  { %v56_v18 = vpop.permute.xlu2 %55  }
  0x74   :  { %v8_v19 = vpop.permute.xlu0 %7   ;;  %v20_v20 = vpop.permute.xlu1 %19  }
  0x75   :  { %10 = vst.msk [vmem:[#allocation0] sm:$0x1] %vm9_vm1, %v8_v19   ;;  %v74_v21 = vpop.permute.xlu2 %73  }
  0x7c   :  { %v14_v22 = vpop.permute.xlu0 %13   ;;  %v26_v23 = vpop.permute.xlu1 %25  }
  0x7d   :  { %16 = vst.msk [vmem:[#allocation0] sm:$0x1] %vm15_vm2, %v14_v22   ;;  %v92_v24 = vpop.permute.xlu2 %91  }
  0x7e   :  { %22 = vst.msk [vmem:[#allocation0] sm:$0x1] %vm21_vm3, %v20_v20  }
  0x7f   :  { %28 = vst.msk [vmem:[#allocation0] sm:$0x1] %vm27_vm4, %v26_v23  }
  0x80   :  { %34 = vst.msk [vmem:[#allocation0] sm:$0x1] %vm33_vm5, %v32_v16  }
  0x81   :  { %40 = vst.msk [vmem:[#allocation0] sm:$0x1] %vm39_vm6, %v38_v17  }
  0x84   :  { %v44_v25 = vpop.permute.xlu0 %43   ;;  %v50_v26 = vpop.permute.xlu1 %49  }
  0x85   :  { %46 = vst.msk [vmem:[#allocation0] sm:$0x1] %vm45_vm7, %v44_v25  }
  0x86   :  { %52 = vst.msk [vmem:[#allocation0] sm:$0x1] %vm51_vm8, %v50_v26  }
  0x87   :  { %58 = vst.msk [vmem:[#allocation0] sm:$0x1] %vm57_vm9, %v56_v18  }
  0x8c   :  { %v62_v27 = vpop.permute.xlu0 %61   ;;  %v68_v28 = vpop.permute.xlu1 %67  }
  0x8d   :  { %64 = vst.msk [vmem:[#allocation0] sm:$0x1] %vm63_vm10, %v62_v27  }
  0x8e   :  { %70 = vst.msk [vmem:[#allocation0] sm:$0x1] %vm69_vm11, %v68_v28  }
  0x8f   :  { %76 = vst.msk [vmem:[#allocation0] sm:$0x1] %vm75_vm12, %v74_v21  }
  0x94   :  { %v80_v29 = vpop.permute.xlu0 %79   ;;  %v86_v30 = vpop.permute.xlu1 %85  }
  0x95   :  { %82 = vst.msk [vmem:[#allocation0] sm:$0x1] %vm81_vm13, %v80_v29  }
  0x96   :  { %88 = vst.msk [vmem:[#allocation0] sm:$0x1] %vm87_vm14, %v86_v30  }
  0x97   :  { %94 = vst.msk [vmem:[#allocation0] sm:$0x1] %vm93_vm15, %v92_v24  }
  0x9e   :  { %v97_v31 = vld [vmem:[#allocation0] sm:$0x1] }
  0x9f   :  { %100 = vst [vmem:[%s208_s1] sm:$0x1] %v97_v31 }

// kernel: conv2d_block_forward.1
= control target key start
LH: loop header
LB: loop body
LE: loop exit
PB: predicated region body
PF: predicated region fallthrough
CT: control target
= control target key end

     0   :  { %s550_s12 = smov 0   ;;  %s619_s0 = inlined_call_operand.vmem [shape: f32[2,18,72], index: 0, kind: input, shape index: {}]   ;;  %s620_s1 = inlined_call_operand.vmem [shape: bf16[3,72,128], index: 1, kind: input, shape index: {}]   ;;  %s621_s2 = inlined_call_operand.vmem [shape: f32[1,128], index: 2, kind: input, shape index: {}]   ;;  %s622_s3 = inlined_call_operand.vmem [shape: f32[2,16,128], index: 3, kind: output, shape index: {}]  }
   0x1 LB: > { %s420_s13 = sadd.s32 4294967295, %s528_s12   ;;  %p424_p0 = scmp.ge.s32.totalorder %s528_s12, 1  ;;  %s528_s12 = sphi %s550_s12, %s13_s12  }
   0x2   : > { %p137_p1 = scmp.lt.s32.totalorder %s528_s12, 3 }
   0x4   : > { %p138_p2 = pnand %p424_p0, %p137_p1 }
   0x5   : > { %p161_p3 = scmp.lt.s32.totalorder (!%p138_p2), %s420_s13, 1 }
   0x6   : > { %141 = sbr.rel (%p138_p2) target bundleno = 184 (0xb8), region = 32 }
   0xb   : > { %v436_v0 = vld [vmem:[%s620_s1 + $0x44] sm:$0xf]  ;;  %v183_v1 = vld [vmem:[%s620_s1 + $0x20] sm:$0xf]  ;;  %v479_v4 = vld [vmem:[%s620_s1 + $0x68] sm:$0xf] }
   0xc   : > { %v214_v2 = vunpack.c.l.b16 %v436_v0  ;;  %v263_v3 = vunpack.c.l.b16 %v183_v1  ;;  %vm228_vm0 = vcmask 1043456   ;;  %v323_v5 = vunpack.c.l.b16 %v479_v4  ;;  %v507_v12 = vld [vmem:[%s620_s1 + $0x3c] sm:$0xff]  ;;  %s624_s13 = smov (!%p161_p3, %s420_s13), 1  ;;  %v506_v15 = vld [vmem:[%s620_s1 + $0x34] sm:$0xff]  ;;  %v505_v18 = vld [vmem:[%s620_s1 + $0x2c] sm:$0xff] }
   0xd   : > { %v503_v13 = vld [vmem:[%s620_s1 + $0x18] sm:$0xff]  ;;  %v511_v14 = vld [vmem:[%s620_s1 + $0x60] sm:$0xff]  ;;  %v502_v16 = vld [vmem:[%s620_s1 + $0x10] sm:$0xff]  ;;  %s512_s30 = smul.u32 24, %s624_s13  ;;  %vm224_vm1 = vcmask 588800   ;;  %s499_s25 = sshll.u32 %s624_s13, 4 }
   0xe   : > { %v219_v6 = vpack.c.b16 %v214_v2, %v214_v2  ;;  %v268_v7 = vpack.c.b16 %v263_v3, %v263_v3  ;;  %v328_v8 = vpack.c.b16 %v323_v5, %v323_v5  ;;  %v510_v17 = vld [vmem:[%s620_s1 + $0x58] sm:$0xff]  ;;  %v501_v19 = vld [vmem:[%s620_s1 + $0x8] sm:$0xff]  ;;  %v509_v20 = vld [vmem:[%s620_s1 + $0x50] sm:$0xff]  ;;  %s170_s28 = scalar_lea.vmem %s622_s3, %s499_s25 }
   0xf   : > { %s165_s14 = scalar_lea.vmem %s619_s0, %s512_s30  ;;  %v504_v21 = vld [vmem:[%s620_s1 + $0x24] sm:$0xff]  ;;  %v521_v36 = vld [vmem:[%s621_s2] ss:$0 sm:$0xff] }
  0x10   : > { %v230_v9 = vsel %vm228_vm0, %v219_v6, 0  ;;  %v277_v10 = vsel %vm228_vm0, %v268_v7, 0  ;;  %v337_v11 = vsel %vm228_vm0, %v328_v8, 0  ;;  %v500_v22 = vld [vmem:[%s620_s1] sm:$0xff]  ;;  %v185_v24 = vld [vmem:[%s165_s14 + $0x9] sm:$0xff] }
  0x11   : > { %235 = vmatpush.bf16.msra.mxu0 %v230_v9  ;;  %282 = vmatpush.bf16.msra.mxu1 %v277_v10  ;;  %v184_v23 = vld [vmem:[%s165_s14 + $0x1] sm:$0xff]  ;;  %v294_v29 = vld [vmem:[%s165_s14 + $0xa] sm:$0xff] }
  0x12   : > { %342 = vmatpush.bf16.msra.mxu2 %v337_v11  ;;  %v172_v25 = vld [vmem:[%s165_s14] sm:$0xff]  ;;  %v173_v26 = vld [vmem:[%s165_s14 + $0x8] sm:$0xff]  ;;  %v186_v30 = vpack.c.bf16 %v185_v24, %v184_v23 }
  0x13   : > { %v508_v27 = vld [vmem:[%s620_s1 + $0x48] sm:$0xff]  ;;  %v174_v31 = vpack.c.bf16 %v173_v26, %v172_v25 }
  0x14   : > { %v293_v28 = vld [vmem:[%s165_s14 + $0x2] sm:$0xff] }
  0x15   : > { %236 = vmatpush.bf16.msra.mxu0 %v507_v12  ;;  %283 = vmatpush.bf16.msra.mxu1 %v503_v13  ;;  %v295_v32 = vpack.c.bf16 %v294_v29, %v293_v28 }
  0x16   : > { %343 = vmatpush.bf16.msra.mxu2 %v511_v14 }
  0x19   : > { %237 = vmatpush.bf16.msra.mxu0 %v506_v15  ;;  %284 = vmatpush.bf16.msra.mxu1 %v502_v16 }
  0x1a   : > { %344 = vmatpush.bf16.msra.mxu2 %v510_v17 }
  0x1d   : > { %238 = vmatpush.bf16.msra.mxu0 %v505_v18  ;;  %285 = vmatpush.bf16.msra.mxu1 %v501_v19 }
  0x1e   : > { %345 = vmatpush.bf16.msra.mxu2 %v509_v20 }
  0x21   : > { %239 = vmatpush.bf16.msra.mxu0 %v504_v21  ;;  %286 = vmatpush.bf16.msra.mxu1 %v500_v22 }
  0x22   : > { %346 = vmatpush.bf16.msra.mxu2 %v508_v27 }
  0x24   : > { %453 = vmatmul.msk.bf16.vlgmr.msra.gmra.mxu0 %vm224_vm1, %v186_v30  ;;  %470 = vmatmul.msk.bf16.vlgmr.msra.gmra.mxu1 %vm224_vm1, %v174_v31 }
  0x25   : > { %496 = vmatmul.msk.bf16.vlgmr.msra.gmra.mxu2 %vm224_vm1, %v295_v32 }
  0xa1   : > { %v241_v33 = vpop.f32.mrf.mxu0  ;;  %v288_v34 = vpop.f32.mrf.mxu1 }
  0xa2   : > { %v289_v35 = vadd.f32 %v288_v34, %v241_v33 }
  0xa8   : > { %v348_v37 = vpop.f32.mrf.mxu2 }
  0xa9   : > { %v353_v38 = vadd.f32 %v348_v37, %v289_v35  ;;  %v243_v40 = vpop.f32.mrf.mxu0  ;;  %v290_v41 = vpop.f32.mrf.mxu1 }
  0xaa   : > { %v291_v43 = vadd.f32 %v290_v41, %v243_v40 }
  0xab   : > { %v359_v39 = vadd.f32 %v521_v36, %v353_v38 }
  0xad   : > { %v361_v42 = vmax.f32 %v359_v39, 0.0 }
  0xaf   : > { %363 = vst [vmem:[%s170_s28] sm:$0xff] %v361_v42 }
  0xb0   : > { %v350_v44 = vpop.f32.mrf.mxu2 }
  0xb1   : > { %v354_v45 = vadd.f32 %v350_v44, %v291_v43 }
  0xb3   : > { %v360_v46 = vadd.f32 %v521_v36, %v354_v45 }
  0xb5   : > { %v362_v47 = vmax.f32 %v360_v46, 0.0 }
  0xb7   : > { %364 = vst [vmem:[%s170_s28 + $0x8] sm:$0xff] %v362_v47 }
  0xb8 PF: > { %s13_s12 = sadd.s32 1, %s528_s12  }
  0xb9   : > { %p10_p4 = scmp.ge.s32.totalorder %s13_s12, 4  }
  0xbb   :  { %12 = sbr.rel (!%p10_p4) target bundleno = 1 (0x1), region = 64 }

</bundles_post_ra>
